<compile_context>
chip_gen: v7x
topology: tpu7x:2x2x1
jax: 0.10.0
libtpu: 0.0.40
codegen_flags: <defaults>
</compile_context>

<pallas_src>
import functools

import jax
import jax.numpy as jnp
from jax.experimental import pallas as pl
from jax.experimental.pallas import tpu as pltpu


def _round_up(x, m):
    return (x + m - 1) // m * m


# ----------------------------- kernel ---------------------------------------
def ffn_kernel(x_ref, w13_ref, w2_ref, o_ref, acc_ref, *, th):
    """One (token-block, hidden-block) grid step of the SwiGLU FFN."""
    h = pl.program_id(1)

    @pl.when(h == 0)
    def _():
        acc_ref[...] = jnp.zeros_like(acc_ref)

    x = x_ref[...]                                                    # (tm, D)
    # Fused gate/value matmul: one MXU contraction producing (tm, 2*th).
    h13 = jnp.dot(x, w13_ref[...], preferred_element_type=jnp.float32)
    h1 = h13[:, :th]                                                  # w1(x)
    h3 = h13[:, th:]                                                  # w3(x)
    gated = (h1 * jax.nn.sigmoid(h1)) * h3                            # silu * gate (f32)
    # Second MXU contraction, accumulated in f32 across hidden blocks.
    acc_ref[...] += jnp.dot(gated.astype(w2_ref.dtype), w2_ref[...],
                            preferred_element_type=jnp.float32)       # (tm, D)

    @pl.when(h == pl.num_programs(1) - 1)
    def _():
        o_ref[...] = acc_ref[...].astype(o_ref.dtype)


# ----------------------------- tile selection --------------------------------
def _block_bytes(tm, th, D, itemsize):
    x_b = tm * D * itemsize
    w13_b = D * 2 * th * itemsize
    w2_b = th * D * itemsize
    o_b = tm * D * itemsize
    acc_b = tm * D * 4                      # f32 accumulator (not pipelined)
    return 2 * (x_b + w13_b + w2_b + o_b) + acc_b


def _choose_tiles(M, D, H, itemsize, tm_req, th_req, budget=44 << 20):
    """Largest (tm, th) whose double-buffered blocks + acc fit the VMEM budget."""
    m_cap = max(_round_up(M, 8), 8)
    tm_cands = []
    for t in (tm_req, 512, 256, 128, 64, 32, 16, 8):
        t = min(t, m_cap)
        if t % 8 == 0 and t not in tm_cands:
            tm_cands.append(t)
    tm_cands.sort(reverse=True)

    th_cands = []
    for t in (th_req, 1024, 512, 256, 128):
        if t <= H and H % t == 0 and t not in th_cands:
            th_cands.append(t)
    if not th_cands:
        th_cands = [H]
    th_cands.sort(reverse=True)

    for tm in tm_cands:
        for th in th_cands:
            if _block_bytes(tm, th, D, itemsize) <= budget:
                return tm, th
    return tm_cands[-1], th_cands[-1]       # fall back to smallest


# ----------------------------- wrapper ---------------------------------------
@functools.partial(jax.jit, static_argnames=("tm", "th"))
def feed_forward(x, w1_t, w3_t, w2_t, *, tm=256, th=512):
    """x: (B, S, D);  w1_t/w3_t: (D, H);  w2_t: (H, D). Returns (B, S, D)."""
    B, S, D = x.shape
    H = w1_t.shape[1]
    M = B * S
    itemsize = jnp.dtype(x.dtype).itemsize

    tm_eff, th_eff = _choose_tiles(M, D, H, itemsize, tm, th)
    M_pad = _round_up(M, tm_eff)
    n_m = M_pad // tm_eff
    n_h = H // th_eff

    # --- fused w1/w3 layout: hidden-block h = [w1_blk_h | w3_blk_h] ---
    w13 = jnp.concatenate(
        [w1_t.reshape(D, n_h, th_eff), w3_t.reshape(D, n_h, th_eff)],
        axis=-1).reshape(D, 2 * H)

    x2d = x.reshape(M, D)
    if M_pad != M:
        x2d = jnp.pad(x2d, ((0, M_pad - M), (0, 0)))

    # --- VMEM limit derived from the actual block footprint (+ headroom) ---
    used = _block_bytes(tm_eff, th_eff, D, itemsize)
    vmem_limit = min(64 << 20, max(32 << 20, used + (8 << 20)))

    cost = pl.CostEstimate(
        flops=6 * M * D * H,                          # 3 matmuls of M*D*H MACs
        transcendentals=M * H,                        # sigmoid
        bytes_accessed=(M * D + 3 * D * H + M * D) * itemsize)

    out2d = pl.pallas_call(
        functools.partial(ffn_kernel, th=th_eff),
        out_shape=jax.ShapeDtypeStruct((M_pad, D), x.dtype),
        grid_spec=pltpu.PrefetchScalarGridSpec(
            num_scalar_prefetch=0,
            grid=(n_m, n_h),
            in_specs=[
                pl.BlockSpec((tm_eff, D), lambda i, h: (i, 0)),        # x block
                pl.BlockSpec((D, 2 * th_eff), lambda i, h: (0, h)),    # fused w1|w3
                pl.BlockSpec((th_eff, D), lambda i, h: (h, 0)),        # w2^T block
            ],
            out_specs=pl.BlockSpec((tm_eff, D), lambda i, h: (i, 0)),
            scratch_shapes=[pltpu.VMEM((tm_eff, D), jnp.float32)],
        ),
        compiler_params=pltpu.CompilerParams(
            dimension_semantics=("parallel", "arbitrary"),
            vmem_limit_bytes=int(vmem_limit)),
        cost_estimate=cost,
    )(x2d, w13, w2_t)

    return out2d[:M].reshape(B, S, D)


# ----------------------------- reference & setup -----------------------------
def feed_forward_ref(x, w1_t, w3_t, w2_t):
    h1 = x @ w1_t
    h3 = x @ w3_t
    return (jax.nn.silu(h1) * h3) @ w2_t


def compute_hidden_dim(dim, multiple_of=256, ffn_dim_multiplier=None):
    hidden_dim = 4 * dim
    hidden_dim = int(2 * hidden_dim / 3)
    if ffn_dim_multiplier is not None:
        hidden_dim = int(ffn_dim_multiplier * hidden_dim)
    hidden_dim = multiple_of * ((hidden_dim + multiple_of - 1) // multiple_of)
    return hidden_dim


if __name__ == "__main__":
    # Small ModelArgs-consistent shapes: dim=128, multiple_of=256 -> hidden=512
    dim = 128
    hidden = compute_hidden_dim(dim, multiple_of=256)    # 512
    batch, seq = 2, 8                                    # 16 tokens

    key = jax.random.PRNGKey(0)
    kx, k1, k2, k3 = jax.random.split(key, 4)

    x = jax.random.normal(kx, (batch, seq, dim), dtype=jnp.float32)
    # nn.Linear-style init (uniform ~ 1/sqrt(fan_in)), stored transposed (in, out)
    w1_t = jax.random.uniform(k1, (dim, hidden), jnp.float32,
                              minval=-1.0, maxval=1.0) / jnp.sqrt(dim)
    w3_t = jax.random.uniform(k3, (dim, hidden), jnp.float32,
                              minval=-1.0, maxval=1.0) / jnp.sqrt(dim)
    w2_t = jax.random.uniform(k2, (hidden, dim), jnp.float32,
                              minval=-1.0, maxval=1.0) / jnp.sqrt(hidden)

    ref = feed_forward_ref(x, w1_t, w3_t, w2_t)

    # float32 path
    out = feed_forward(x, w1_t, w3_t, w2_t)
    jax.block_until_ready(out)
    assert out.shape == (batch, seq, dim)
    assert jnp.allclose(out, ref, atol=1e-4, rtol=1e-4), \
        f"f32 max abs err = {jnp.max(jnp.abs(out - ref))}"

    # bfloat16 path (recommended for real model shapes; looser tolerance)
    out_bf16 = feed_forward(
        x.astype(jnp.bfloat16), w1_t.astype(jnp.bfloat16),
        w3_t.astype(jnp.bfloat16), w2_t.astype(jnp.bfloat16))
    jax.block_until_ready(out_bf16)
    assert jnp.allclose(out_bf16.astype(jnp.float32), ref, atol=8e-2, rtol=8e-2), \
        f"bf16 max abs err = {jnp.max(jnp.abs(out_bf16.astype(jnp.float32) - ref))}"

    print("KERNEL_OK")
</pallas_src>

<mosaic_0001>
module attributes {stable_mosaic.version = 11 : i64} {
  func.func @ffn_kernel(%arg0: i32, %arg1: i32, %arg2: memref<16x128xf32, #tpu.memory_space<vmem>>, %arg3: memref<128x1024xf32, #tpu.memory_space<vmem>>, %arg4: memref<512x128xf32, #tpu.memory_space<vmem>>, %arg5: memref<16x128xf32, #tpu.memory_space<vmem>>, %arg6: memref<16x128xf32, #tpu.memory_space<vmem>>) attributes {dimension_semantics = [#tpu.dimension_semantics<parallel>, #tpu.dimension_semantics<arbitrary>], iteration_bounds = array<i64: 1, 1>, scalar_prefetch = 0 : i64, scratch_operands = 1 : i64, tpu.core_type = #tpu.core_type<tc>, window_params = [{transform_indices = @transform_0, window_bounds = array<i64: 16, 128>}, {transform_indices = @transform_1, window_bounds = array<i64: 128, 1024>}, {transform_indices = @transform_2, window_bounds = array<i64: 512, 128>}, {transform_indices = @transform_3, window_bounds = array<i64: 16, 128>}]} {
    %c0_i32 = arith.constant 0 : i32
    %0 = arith.cmpi eq, %arg1, %c0_i32 : i32
    %1 = arith.extui %0 : i1 to i32
    %c0_i32_0 = arith.constant 0 : i32
    %2 = arith.cmpi ne, %1, %c0_i32_0 : i32
    scf.if %2 {
      %cst_14 = arith.constant 0.000000e+00 : f32
      %23 = vector.broadcast %cst_14 : f32 to vector<16x128xf32>
      %c0_15 = arith.constant 0 : index
      %c0_16 = arith.constant 0 : index
      %24 = vector.load %arg6[%c0_15, %c0_16] : memref<16x128xf32, #tpu.memory_space<vmem>>, vector<16x128xf32>
      tpu.vector_store %arg6[%c0_15, %c0_16], %23 {strides = array<i32>} : memref<16x128xf32, #tpu.memory_space<vmem>>, vector<16x128xf32>,
    } else {
    }
    %c0 = arith.constant 0 : index
    %c0_1 = arith.constant 0 : index
    %3 = vector.load %arg2[%c0, %c0_1] : memref<16x128xf32, #tpu.memory_space<vmem>>, vector<16x128xf32>
    %c0_2 = arith.constant 0 : index
    %c0_3 = arith.constant 0 : index
    %4 = vector.load %arg3[%c0_2, %c0_3] : memref<128x1024xf32, #tpu.memory_space<vmem>>, vector<128x1024xf32>
    %cst = arith.constant dense<0.000000e+00> : vector<16x1024xf32>
    %5 = tpu.matmul %3, %4, %cst {dimension_numbers = #tpu.dot_dimension_numbers<[1], [0], [0], [1], [0, 0, 1, 1], [], []>} : vector<16x128xf32>, vector<128x1024xf32>, vector<16x1024xf32> -> vector<16x1024xf32>
    %6 = vector.extract_strided_slice %5 {offsets = [0, 0], sizes = [16, 512], strides = [1, 1]} : vector<16x1024xf32> to vector<16x512xf32>
    %7 = vector.extract_strided_slice %5 {offsets = [0, 512], sizes = [16, 512], strides = [1, 1]} : vector<16x1024xf32> to vector<16x512xf32>
    %8 = arith.negf %6 : vector<16x512xf32>
    %9 = math.exp %8 : vector<16x512xf32>
    %cst_4 = arith.constant 1.000000e+00 : f32
    %10 = vector.broadcast %cst_4 : f32 to vector<16x512xf32>
    %11 = arith.addf %10, %9 : vector<16x512xf32>
    %12 = arith.divf %10, %11 : vector<16x512xf32>
    %13 = arith.mulf %6, %12 : vector<16x512xf32>
    %14 = arith.mulf %13, %7 : vector<16x512xf32>
    %c0_5 = arith.constant 0 : index
    %c0_6 = arith.constant 0 : index
    %15 = vector.load %arg6[%c0_5, %c0_6] : memref<16x128xf32, #tpu.memory_space<vmem>>, vector<16x128xf32>
    %c0_7 = arith.constant 0 : index
    %c0_8 = arith.constant 0 : index
    %16 = vector.load %arg4[%c0_7, %c0_8] : memref<512x128xf32, #tpu.memory_space<vmem>>, vector<512x128xf32>
    %cst_9 = arith.constant dense<0.000000e+00> : vector<16x128xf32>
    %17 = tpu.matmul %14, %16, %cst_9 {dimension_numbers = #tpu.dot_dimension_numbers<[1], [0], [0], [1], [0, 0, 1, 1], [], []>} : vector<16x512xf32>, vector<512x128xf32>, vector<16x128xf32> -> vector<16x128xf32>
    %18 = arith.addf %15, %17 : vector<16x128xf32>
    %c0_10 = arith.constant 0 : index
    %c0_11 = arith.constant 0 : index
    %19 = vector.load %arg6[%c0_10, %c0_11] : memref<16x128xf32, #tpu.memory_space<vmem>>, vector<16x128xf32>
    tpu.vector_store %arg6[%c0_10, %c0_11], %18 {strides = array<i32>} : memref<16x128xf32, #tpu.memory_space<vmem>>, vector<16x128xf32>,
    %c0_i32_12 = arith.constant 0 : i32
    %20 = arith.cmpi eq, %arg1, %c0_i32_12 : i32
    %21 = arith.extui %20 : i1 to i32
    %c0_i32_13 = arith.constant 0 : i32
    %22 = arith.cmpi ne, %21, %c0_i32_13 : i32
    scf.if %22 {
      %c0_14 = arith.constant 0 : index
      %c0_15 = arith.constant 0 : index
      %23 = vector.load %arg6[%c0_14, %c0_15] : memref<16x128xf32, #tpu.memory_space<vmem>>, vector<16x128xf32>
      %c0_16 = arith.constant 0 : index
      %c0_17 = arith.constant 0 : index
      %24 = vector.load %arg5[%c0_16, %c0_17] : memref<16x128xf32, #tpu.memory_space<vmem>>, vector<16x128xf32>
      tpu.vector_store %arg5[%c0_16, %c0_17], %23 {strides = array<i32>} : memref<16x128xf32, #tpu.memory_space<vmem>>, vector<16x128xf32>,
    } else {
    }
    return
  }
  func.func @transform_0(%arg0: i32, %arg1: i32) -> (i32, i32) {
    %c0_i32 = arith.constant 0 : i32
    %c0_i32_0 = arith.constant 0 : i32
    return %arg0, %c0_i32 : i32, i32
  }
  func.func @transform_1(%arg0: i32, %arg1: i32) -> (i32, i32) {
    %c0_i32 = arith.constant 0 : i32
    %c0_i32_0 = arith.constant 0 : i32
    return %c0_i32, %arg1 : i32, i32
  }
  func.func @transform_2(%arg0: i32, %arg1: i32) -> (i32, i32) {
    %c0_i32 = arith.constant 0 : i32
    %c0_i32_0 = arith.constant 0 : i32
    return %arg1, %c0_i32 : i32, i32
  }
  func.func @transform_3(%arg0: i32, %arg1: i32) -> (i32, i32) {
    %c0_i32 = arith.constant 0 : i32
    %c0_i32_0 = arith.constant 0 : i32
    return %arg0, %c0_i32 : i32, i32
  }
}

</mosaic_0001>

<bundles_post_ra>
// kernel: feed_forward.1
= control target key start
LH: loop header
LB: loop body
LE: loop exit
PB: predicated region body
PF: predicated region fallthrough
CT: control target
= control target key end

     0   :  { %v1102_v7 = vmov 0.0   ;;  %s1740_s0 = inlined_call_operand.vmem [shape: f32[16,128], index: 0, kind: input, shape index: {}]   ;;  %s1741_s1 = inlined_call_operand.vmem [shape: f32[128,1024], index: 1, kind: input, shape index: {}]   ;;  %s1742_s2 = inlined_call_operand.vmem [shape: f32[512,128], index: 2, kind: input, shape index: {}]   ;;  %s1743_s3 = inlined_call_operand.hbm [shape: f32[16,128], index: 3, kind: output, shape index: {}]  }
   0x1   :  { %v24_v0 = vld [vmem:[%s1741_s1 + $0x8] sm:$0xff]  ;;  %v26_v2 = vld [vmem:[%s1741_s1 + $0x18] sm:$0xff]  ;;  %v23_v5 = vld [vmem:[%s1741_s1] sm:$0xff]  ;;  %215 = vmatprep.mubr.f32.mxu0 %v1102_v7  ;;  %292 = vmatprep.mubr.f32.mxu1 %v1102_v7 }
   0x2   :  { %v32_v1 = vld [vmem:[%s1741_s1 + $0x48] sm:$0xff]  ;;  %v34_v4 = vld [vmem:[%s1741_s1 + $0x58] sm:$0xff]  ;;  %v31_v6 = vld [vmem:[%s1741_s1 + $0x40] sm:$0xff] }
   0x3   :  { %v850_v3 = vpack.c.bf16 %v32_v1, %v24_v0  ;;  %v882_v8 = vpack.c.bf16 %v34_v4, %v26_v2  ;;  %v852_v9 = vpack.c.bf16 %v31_v6, %v23_v5  ;;  %v25_v10 = vld [vmem:[%s1741_s1 + $0x10] sm:$0xff]  ;;  %v40_v12 = vld [vmem:[%s1741_s1 + $0x88] sm:$0xff]  ;;  %v42_v15 = vld [vmem:[%s1741_s1 + $0x98] sm:$0xff] }
   0x4   :  { %v33_v11 = vld [vmem:[%s1741_s1 + $0x50] sm:$0xff]  ;;  %v48_v14 = vld [vmem:[%s1741_s1 + $0xc8] sm:$0xff]  ;;  %v50_v16 = vld [vmem:[%s1741_s1 + $0xd8] sm:$0xff] }
   0x5   :  { %851 = vmatprep.subr.bf16.mxu0 %v850_v3  ;;  %v884_v13 = vpack.c.bf16 %v33_v11, %v25_v10  ;;  %883 = vmatprep.subr.bf16.mxu1 %v882_v8  ;;  %v854_v17 = vpack.c.bf16 %v48_v14, %v40_v12  ;;  %v886_v18 = vpack.c.bf16 %v50_v16, %v42_v15  ;;  %v39_v19 = vld [vmem:[%s1741_s1 + $0x80] sm:$0xff]  ;;  %v41_v21 = vld [vmem:[%s1741_s1 + $0x90] sm:$0xff]  ;;  %v56_v24 = vld [vmem:[%s1741_s1 + $0x108] sm:$0xff] }
   0x6   :  { %853 = vmatpush1.bf16.msra.mxu0 %v852_v9  ;;  %v47_v20 = vld [vmem:[%s1741_s1 + $0xc0] sm:$0xff]  ;;  %v49_v23 = vld [vmem:[%s1741_s1 + $0xd0] sm:$0xff]  ;;  %v64_v25 = vld [vmem:[%s1741_s1 + $0x148] sm:$0xff] }
   0x7   :  { %885 = vmatpush1.bf16.msra.mxu1 %v884_v13  ;;  %v856_v22 = vpack.c.bf16 %v47_v20, %v39_v19  ;;  %855 = vmatprep.subr.bf16.mxu0 %v854_v17  ;;  %v888_v26 = vpack.c.bf16 %v49_v23, %v41_v21  ;;  %v858_v27 = vpack.c.bf16 %v64_v25, %v56_v24  ;;  %v58_v28 = vld [vmem:[%s1741_s1 + $0x118] sm:$0xff]  ;;  %v55_v30 = vld [vmem:[%s1741_s1 + $0x100] sm:$0xff]  ;;  %v57_v33 = vld [vmem:[%s1741_s1 + $0x110] sm:$0xff] }
   0x8   :  { %887 = vmatprep.subr.bf16.mxu1 %v886_v18  ;;  %v66_v29 = vld [vmem:[%s1741_s1 + $0x158] sm:$0xff]  ;;  %v63_v32 = vld [vmem:[%s1741_s1 + $0x140] sm:$0xff]  ;;  %v65_v34 = vld [vmem:[%s1741_s1 + $0x150] sm:$0xff] }
   0x9   :  { %v890_v31 = vpack.c.bf16 %v66_v29, %v58_v28  ;;  %v860_v35 = vpack.c.bf16 %v63_v32, %v55_v30  ;;  %v72_v36 = vld [vmem:[%s1741_s1 + $0x188] sm:$0xff]  ;;  %v74_v38 = vld [vmem:[%s1741_s1 + $0x198] sm:$0xff]  ;;  %v892_v39 = vpack.c.bf16 %v65_v34, %v57_v33  ;;  %v71_v42 = vld [vmem:[%s1741_s1 + $0x180] sm:$0xff] }
   0xa   :  { %857 = vmatpush1.bf16.msra.mxu0 %v856_v22  ;;  %v80_v37 = vld [vmem:[%s1741_s1 + $0x1c8] sm:$0xff]  ;;  %v82_v41 = vld [vmem:[%s1741_s1 + $0x1d8] sm:$0xff]  ;;  %v79_v43 = vld [vmem:[%s1741_s1 + $0x1c0] sm:$0xff] }
   0xb   :  { %889 = vmatpush1.bf16.msra.mxu1 %v888_v26  ;;  %859 = vmatprep.subr.bf16.mxu0 %v858_v27  ;;  %v862_v40 = vpack.c.bf16 %v80_v37, %v72_v36  ;;  %v894_v44 = vpack.c.bf16 %v82_v41, %v74_v38  ;;  %v73_v45 = vld [vmem:[%s1741_s1 + $0x190] sm:$0xff]  ;;  %v88_v47 = vld [vmem:[%s1741_s1 + $0x208] sm:$0xff]  ;;  %v90_v49 = vld [vmem:[%s1741_s1 + $0x218] sm:$0xff]  ;;  %v864_v51 = vpack.c.bf16 %v79_v43, %v71_v42 }
   0xc   :  { %891 = vmatprep.subr.bf16.mxu1 %v890_v31  ;;  %v81_v46 = vld [vmem:[%s1741_s1 + $0x1d0] sm:$0xff]  ;;  %v96_v48 = vld [vmem:[%s1741_s1 + $0x248] sm:$0xff]  ;;  %v98_v50 = vld [vmem:[%s1741_s1 + $0x258] sm:$0xff] }
   0xd   :  { %v896_v52 = vpack.c.bf16 %v81_v46, %v73_v45  ;;  %v866_v53 = vpack.c.bf16 %v96_v48, %v88_v47  ;;  %v87_v54 = vld [vmem:[%s1741_s1 + $0x200] sm:$0xff]  ;;  %v89_v56 = vld [vmem:[%s1741_s1 + $0x210] sm:$0xff]  ;;  %v898_v57 = vpack.c.bf16 %v98_v50, %v90_v49  ;;  %v104_v59 = vld [vmem:[%s1741_s1 + $0x288] sm:$0xff] }
   0xe   :  { %861 = vmatpush1.bf16.msra.mxu0 %v860_v35  ;;  %v95_v55 = vld [vmem:[%s1741_s1 + $0x240] sm:$0xff]  ;;  %v97_v58 = vld [vmem:[%s1741_s1 + $0x250] sm:$0xff]  ;;  %v112_v60 = vld [vmem:[%s1741_s1 + $0x2c8] sm:$0xff] }
   0xf   :  { %893 = vmatpush1.bf16.msra.mxu1 %v892_v39  ;;  %863 = vmatprep.subr.bf16.mxu0 %v862_v40  ;;  %v106_v61 = vld [vmem:[%s1741_s1 + $0x298] sm:$0xff]  ;;  %v868_v63 = vpack.c.bf16 %v95_v55, %v87_v54  ;;  %v900_v0 = vpack.c.bf16 %v97_v58, %v89_v56  ;;  %v870_v1 = vpack.c.bf16 %v112_v60, %v104_v59  ;;  %v103_v2 = vld [vmem:[%s1741_s1 + $0x280] sm:$0xff]  ;;  %v105_v4 = vld [vmem:[%s1741_s1 + $0x290] sm:$0xff] }
  0x10   :  { %895 = vmatprep.subr.bf16.mxu1 %v894_v44  ;;  %v114_v62 = vld [vmem:[%s1741_s1 + $0x2d8] sm:$0xff]  ;;  %v111_v3 = vld [vmem:[%s1741_s1 + $0x2c0] sm:$0xff]  ;;  %v113_v6 = vld [vmem:[%s1741_s1 + $0x2d0] sm:$0xff] }
  0x11   :  { %v902_v5 = vpack.c.bf16 %v114_v62, %v106_v61  ;;  %v120_v8 = vld [vmem:[%s1741_s1 + $0x308] sm:$0xff]  ;;  %v122_v10 = vld [vmem:[%s1741_s1 + $0x318] sm:$0xff]  ;;  %v872_v12 = vpack.c.bf16 %v111_v3, %v103_v2  ;;  %v904_v13 = vpack.c.bf16 %v113_v6, %v105_v4  ;;  %v119_v15 = vld [vmem:[%s1741_s1 + $0x300] sm:$0xff] }
  0x12   :  { %865 = vmatpush1.bf16.msra.mxu0 %v864_v51  ;;  %v128_v9 = vld [vmem:[%s1741_s1 + $0x348] sm:$0xff]  ;;  %v130_v11 = vld [vmem:[%s1741_s1 + $0x358] sm:$0xff]  ;;  %v127_v16 = vld [vmem:[%s1741_s1 + $0x340] sm:$0xff] }
  0x13   :  { %897 = vmatpush1.bf16.msra.mxu1 %v896_v52  ;;  %867 = vmatprep.subr.bf16.mxu0 %v866_v53  ;;  %v874_v14 = vpack.c.bf16 %v128_v9, %v120_v8  ;;  %v121_v17 = vld [vmem:[%s1741_s1 + $0x310] sm:$0xff]  ;;  %v906_v18 = vpack.c.bf16 %v130_v11, %v122_v10  ;;  %v136_v20 = vld [vmem:[%s1741_s1 + $0x388] sm:$0xff]  ;;  %v138_v22 = vld [vmem:[%s1741_s1 + $0x398] sm:$0xff]  ;;  %v876_v24 = vpack.c.bf16 %v127_v16, %v119_v15 }
  0x14   :  { %899 = vmatprep.subr.bf16.mxu1 %v898_v57  ;;  %v129_v19 = vld [vmem:[%s1741_s1 + $0x350] sm:$0xff]  ;;  %v144_v21 = vld [vmem:[%s1741_s1 + $0x3c8] sm:$0xff]  ;;  %v146_v23 = vld [vmem:[%s1741_s1 + $0x3d8] sm:$0xff] }
  0x15   :  { %v908_v25 = vpack.c.bf16 %v129_v19, %v121_v17  ;;  %v878_v26 = vpack.c.bf16 %v144_v21, %v136_v20  ;;  %v135_v27 = vld [vmem:[%s1741_s1 + $0x380] sm:$0xff]  ;;  %v137_v29 = vld [vmem:[%s1741_s1 + $0x390] sm:$0xff]  ;;  %v910_v30 = vpack.c.bf16 %v146_v23, %v138_v22  ;;  %v28_v32 = vld [vmem:[%s1741_s1 + $0x28] sm:$0xff] }
  0x16   :  { %869 = vmatpush1.bf16.msra.mxu0 %v868_v63  ;;  %v143_v28 = vld [vmem:[%s1741_s1 + $0x3c0] sm:$0xff]  ;;  %v145_v31 = vld [vmem:[%s1741_s1 + $0x3d0] sm:$0xff]  ;;  %v36_v33 = vld [vmem:[%s1741_s1 + $0x68] sm:$0xff] }
  0x17   :  { %901 = vmatpush1.bf16.msra.mxu1 %v900_v0  ;;  %871 = vmatprep.subr.bf16.mxu0 %v870_v1  ;;  %v30_v34 = vld [vmem:[%s1741_s1 + $0x38] sm:$0xff]  ;;  %v880_v36 = vpack.c.bf16 %v143_v28, %v135_v27  ;;  %v912_v37 = vpack.c.bf16 %v145_v31, %v137_v29  ;;  %v914_v38 = vpack.c.bf16 %v36_v33, %v28_v32  ;;  %v27_v39 = vld [vmem:[%s1741_s1 + $0x20] sm:$0xff]  ;;  %v29_v42 = vld [vmem:[%s1741_s1 + $0x30] sm:$0xff] }
  0x18   :  { %903 = vmatprep.subr.bf16.mxu1 %v902_v5  ;;  %v38_v35 = vld [vmem:[%s1741_s1 + $0x78] sm:$0xff]  ;;  %v35_v40 = vld [vmem:[%s1741_s1 + $0x60] sm:$0xff]  ;;  %v37_v43 = vld [vmem:[%s1741_s1 + $0x70] sm:$0xff] }
  0x19   :  { %v946_v41 = vpack.c.bf16 %v38_v35, %v30_v34  ;;  %v44_v44 = vld [vmem:[%s1741_s1 + $0xa8] sm:$0xff]  ;;  %v1353_v46 = vld [vmem:[%s1740_s0] sm:$0xff]  ;;  %v916_v47 = vpack.c.bf16 %v35_v40, %v27_v39  ;;  %v46_v48 = vld [vmem:[%s1741_s1 + $0xb8] sm:$0xff]  ;;  %v948_v50 = vpack.c.bf16 %v37_v43, %v29_v42 }
  0x1a   :  { %873 = vmatpush1.bf16.msra.mxu0 %v872_v12  ;;  %v52_v45 = vld [vmem:[%s1741_s1 + $0xe8] sm:$0xff]  ;;  %v54_v49 = vld [vmem:[%s1741_s1 + $0xf8] sm:$0xff]  ;;  %v43_v51 = vld [vmem:[%s1741_s1 + $0xa0] sm:$0xff] }
  0x1b   :  { %905 = vmatpush1.bf16.msra.mxu1 %v904_v13  ;;  %875 = vmatprep.subr.bf16.mxu0 %v874_v14  ;;  %v51_v52 = vld [vmem:[%s1741_s1 + $0xe0] sm:$0xff]  ;;  %v45_v53 = vld [vmem:[%s1741_s1 + $0xb0] sm:$0xff]  ;;  %v918_v54 = vpack.c.bf16 %v52_v45, %v44_v44  ;;  %v60_v56 = vld [vmem:[%s1741_s1 + $0x128] sm:$0xff]  ;;  %v950_v58 = vpack.c.bf16 %v54_v49, %v46_v48 }
  0x1c   :  { %907 = vmatprep.subr.bf16.mxu1 %v906_v18  ;;  %v53_v55 = vld [vmem:[%s1741_s1 + $0xf0] sm:$0xff]  ;;  %v68_v57 = vld [vmem:[%s1741_s1 + $0x168] sm:$0xff]  ;;  %v62_v59 = vld [vmem:[%s1741_s1 + $0x138] sm:$0xff]  ;;  %v920_v62 = vpack.c.bf16 %v51_v52, %v43_v51 }
  0x1d   :  { %v70_v60 = vld [vmem:[%s1741_s1 + $0x178] sm:$0xff]  ;;  %v1390_v61 = vld [vmem:[%s1740_s0 + $0x8] sm:$0xff]  ;;  %v952_v63 = vpack.c.bf16 %v53_v55, %v45_v53  ;;  %v922_v0 = vpack.c.bf16 %v68_v57, %v60_v56  ;;  %v59_v1 = vld [vmem:[%s1741_s1 + $0x120] sm:$0xff] }
  0x1e   :  { %877 = vmatpush1.bf16.msra.mxu0 %v876_v24  ;;  %v67_v2 = vld [vmem:[%s1741_s1 + $0x160] sm:$0xff]  ;;  %v61_v3 = vld [vmem:[%s1741_s1 + $0x130] sm:$0xff]  ;;  %v954_v4 = vpack.c.bf16 %v70_v60, %v62_v59  ;;  %v76_v6 = vld [vmem:[%s1741_s1 + $0x1a8] sm:$0xff] }
  0x1f   :  { %909 = vmatpush1.bf16.msra.mxu1 %v908_v25  ;;  %879 = vmatprep.subr.bf16.mxu0 %v878_v26  ;;  %v69_v5 = vld [vmem:[%s1741_s1 + $0x170] sm:$0xff]  ;;  %v84_v8 = vld [vmem:[%s1741_s1 + $0x1e8] sm:$0xff]  ;;  %v78_v9 = vld [vmem:[%s1741_s1 + $0x1b8] sm:$0xff]  ;;  %v924_v11 = vpack.c.bf16 %v67_v2, %v59_v1 }
  0x20   :  { %911 = vmatprep.subr.bf16.mxu1 %v910_v30  ;;  %v86_v10 = vld [vmem:[%s1741_s1 + $0x1f8] sm:$0xff]  ;;  %v956_v12 = vpack.c.bf16 %v69_v5, %v61_v3  ;;  %v926_v13 = vpack.c.bf16 %v84_v8, %v76_v6  ;;  %v75_v14 = vld [vmem:[%s1741_s1 + $0x1a0] sm:$0xff]  ;;  %v77_v16 = vld [vmem:[%s1741_s1 + $0x1b0] sm:$0xff] }
  0x21   :  { %v83_v15 = vld [vmem:[%s1741_s1 + $0x1e0] sm:$0xff]  ;;  %v958_v17 = vpack.c.bf16 %v86_v10, %v78_v9  ;;  %v85_v18 = vld [vmem:[%s1741_s1 + $0x1f0] sm:$0xff]  ;;  %v92_v19 = vld [vmem:[%s1741_s1 + $0x228] sm:$0xff] }
  0x22   :  { %881 = vmatpush1.bf16.msra.mxu0 %v880_v36  ;;  %v100_v20 = vld [vmem:[%s1741_s1 + $0x268] sm:$0xff]  ;;  %v94_v21 = vld [vmem:[%s1741_s1 + $0x238] sm:$0xff] }
  0x23   :  { %913 = vmatpush1.bf16.msra.mxu1 %v912_v37  ;;  %915 = vmatprep.subr.bf16.mxu0 %v914_v38  ;;  %v102_v22 = vld [vmem:[%s1741_s1 + $0x278] sm:$0xff] }
  0x24   :  { %947 = vmatprep.subr.bf16.mxu1 %v946_v41 }
  0x25   :  { %216 = vmatmul.mubr.f32.vlgmr.msra.gmra.mrb[0].mxu0 %v1353_v46 }
  0x26   :  { %293 = vmatmul.mubr.f32.vlgmr.msra.gmra.mrb[0].mxu1 %v1353_v46  ;;  %917 = vmatpush1.bf16.msra.mxu0 %v916_v47 }
  0x27   :  { %949 = vmatpush1.bf16.msra.mxu1 %v948_v50  ;;  %221 = vmatprep.mubr.f32.mxu0 %v1102_v7 }
  0x28   :  { %298 = vmatprep.mubr.f32.mxu1 %v1102_v7  ;;  %919 = vmatprep.subr.bf16.mxu0 %v918_v54 }
  0x29   :  { %222 = vmatmul.mubr.f32.gmra.mrb[2].mxu0 %v1390_v61  ;;  %951 = vmatprep.subr.bf16.mxu1 %v950_v58 }
  0x2a   :  { %299 = vmatmul.mubr.f32.gmra.mrb[2].mxu1 %v1390_v61  ;;  %921 = vmatpush1.bf16.msra.mxu0 %v920_v62 }
  0x2b   :  { %953 = vmatpush1.bf16.msra.mxu1 %v952_v63  ;;  %923 = vmatprep.subr.bf16.mxu0 %v922_v0 }
  0x2c   :  { %955 = vmatprep.subr.bf16.mxu1 %v954_v4  ;;  %369 = vmatprep.mubr.f32.mxu0 %v1102_v7 }
  0x2d   :  { %446 = vmatprep.mubr.f32.mxu1 %v1102_v7 }
  0x2e   :  { %8 = vsyncpa [#allocation4], 0  ;;  %925 = vmatpush1.bf16.msra.mxu0 %v924_v11  ;;  %v928_v23 = vpack.c.bf16 %v83_v15, %v75_v14  ;;  %v960_v24 = vpack.c.bf16 %v85_v18, %v77_v16  ;;  %v930_v25 = vpack.c.bf16 %v100_v20, %v92_v19  ;;  %v91_v26 = vld [vmem:[%s1741_s1 + $0x220] sm:$0xff]  ;;  %v93_v28 = vld [vmem:[%s1741_s1 + $0x230] sm:$0xff]  ;;  %v962_v29 = vpack.c.bf16 %v102_v22, %v94_v21 }
  0x2f   :  { %957 = vmatpush1.bf16.msra.mxu1 %v956_v12  ;;  %927 = vmatprep.subr.bf16.mxu0 %v926_v13  ;;  %v99_v27 = vld [vmem:[%s1741_s1 + $0x260] sm:$0xff]  ;;  %v101_v30 = vld [vmem:[%s1741_s1 + $0x270] sm:$0xff]  ;;  %v108_v31 = vld [vmem:[%s1741_s1 + $0x2a8] sm:$0xff] }
  0x30   :  { %959 = vmatprep.subr.bf16.mxu1 %v958_v17  ;;  %v116_v32 = vld [vmem:[%s1741_s1 + $0x2e8] sm:$0xff]  ;;  %v110_v33 = vld [vmem:[%s1741_s1 + $0x2b8] sm:$0xff]  ;;  %v932_v35 = vpack.c.bf16 %v99_v27, %v91_v26  ;;  %v964_v36 = vpack.c.bf16 %v101_v30, %v93_v28  ;;  %v107_v38 = vld [vmem:[%s1741_s1 + $0x2a0] sm:$0xff] }
  0x31   :  { %v118_v34 = vld [vmem:[%s1741_s1 + $0x2f8] sm:$0xff]  ;;  %v934_v37 = vpack.c.bf16 %v116_v32, %v108_v31  ;;  %v115_v39 = vld [vmem:[%s1741_s1 + $0x2e0] sm:$0xff]  ;;  %v109_v40 = vld [vmem:[%s1741_s1 + $0x2b0] sm:$0xff] }
  0x32   :  { %929 = vmatpush1.bf16.msra.mxu0 %v928_v23  ;;  %v966_v41 = vpack.c.bf16 %v118_v34, %v110_v33  ;;  %v117_v42 = vld [vmem:[%s1741_s1 + $0x2f0] sm:$0xff]  ;;  %v124_v43 = vld [vmem:[%s1741_s1 + $0x328] sm:$0xff]  ;;  %v126_v45 = vld [vmem:[%s1741_s1 + $0x338] sm:$0xff]  ;;  %v936_v48 = vpack.c.bf16 %v115_v39, %v107_v38 }
  0x33   :  { %961 = vmatpush1.bf16.msra.mxu1 %v960_v24  ;;  %931 = vmatprep.subr.bf16.mxu0 %v930_v25  ;;  %v132_v44 = vld [vmem:[%s1741_s1 + $0x368] sm:$0xff]  ;;  %v134_v47 = vld [vmem:[%s1741_s1 + $0x378] sm:$0xff]  ;;  %v968_v49 = vpack.c.bf16 %v117_v42, %v109_v40  ;;  %v123_v51 = vld [vmem:[%s1741_s1 + $0x320] sm:$0xff] }
  0x34   :  { %963 = vmatprep.subr.bf16.mxu1 %v962_v29  ;;  %v938_v50 = vpack.c.bf16 %v132_v44, %v124_v43  ;;  %v131_v52 = vld [vmem:[%s1741_s1 + $0x360] sm:$0xff]  ;;  %v125_v53 = vld [vmem:[%s1741_s1 + $0x330] sm:$0xff]  ;;  %v970_v54 = vpack.c.bf16 %v134_v47, %v126_v45  ;;  %v140_v56 = vld [vmem:[%s1741_s1 + $0x3a8] sm:$0xff] }
  0x35   :  { %v133_v55 = vld [vmem:[%s1741_s1 + $0x370] sm:$0xff]  ;;  %v148_v57 = vld [vmem:[%s1741_s1 + $0x3e8] sm:$0xff]  ;;  %v142_v58 = vld [vmem:[%s1741_s1 + $0x3b8] sm:$0xff]  ;;  %v940_v60 = vpack.c.bf16 %v131_v52, %v123_v51 }
  0x36   :  { %933 = vmatpush1.bf16.msra.mxu0 %v932_v35  ;;  %v150_v59 = vld [vmem:[%s1741_s1 + $0x3f8] sm:$0xff]  ;;  %v972_v62 = vpack.c.bf16 %v133_v55, %v125_v53  ;;  %v942_v63 = vpack.c.bf16 %v148_v57, %v140_v56  ;;  %v139_v0 = vld [vmem:[%s1741_s1 + $0x3a0] sm:$0xff]  ;;  %v141_v3 = vld [vmem:[%s1741_s1 + $0x3b0] sm:$0xff] }
  0x37   :  { %965 = vmatpush1.bf16.msra.mxu1 %v964_v36  ;;  %935 = vmatprep.subr.bf16.mxu0 %v934_v37  ;;  %v147_v1 = vld [vmem:[%s1741_s1 + $0x3e0] sm:$0xff]  ;;  %v974_v2 = vpack.c.bf16 %v150_v59, %v142_v58  ;;  %v149_v4 = vld [vmem:[%s1741_s1 + $0x3f0] sm:$0xff]  ;;  %v542_v9 = vld [vmem:[%s1742_s2 + $0x88] sm:$0xff] }
  0x38   :  { %967 = vmatprep.subr.bf16.mxu1 %v966_v41  ;;  %v944_v5 = vpack.c.bf16 %v147_v1, %v139_v0  ;;  %v976_v6 = vpack.c.bf16 %v149_v4, %v141_v3  ;;  %v541_v8 = vld [vmem:[%s1742_s2 + $0x80] sm:$0xff]  ;;  %v526_v11 = vld [vmem:[%s1742_s2 + $0x8] sm:$0xff]  ;;  %v543_v17 = vld [vmem:[%s1742_s2 + $0x90] sm:$0xff] }
  0x39   :  { %v978_v10 = vpack.c.bf16 %v542_v9, %v541_v8  ;;  %v557_v14 = vld [vmem:[%s1742_s2 + $0x100] sm:$0xff]  ;;  %v558_v15 = vld [vmem:[%s1742_s2 + $0x108] sm:$0xff]  ;;  %v544_v18 = vld [vmem:[%s1742_s2 + $0x98] sm:$0xff] }
  0x3a   :  { %937 = vmatpush1.bf16.msra.mxu0 %v936_v48  ;;  %v1012_v16 = vpack.c.bf16 %v558_v15, %v557_v14  ;;  %v575_v19 = vld [vmem:[%s1742_s2 + $0x190] sm:$0xff]  ;;  %v982_v20 = vpack.c.bf16 %v544_v18, %v543_v17  ;;  %v576_v21 = vld [vmem:[%s1742_s2 + $0x198] sm:$0xff]  ;;  %v545_v29 = vld [vmem:[%s1742_s2 + $0xa0] sm:$0xff] }
  0x3b   :  { %969 = vmatpush1.bf16.msra.mxu1 %v968_v49  ;;  %939 = vmatprep.subr.bf16.mxu0 %v938_v50  ;;  %v527_v22 = vld [vmem:[%s1742_s2 + $0x10] sm:$0xff]  ;;  %v528_v23 = vld [vmem:[%s1742_s2 + $0x18] sm:$0xff]  ;;  %v1014_v24 = vpack.c.bf16 %v576_v21, %v575_v19  ;;  %v546_v30 = vld [vmem:[%s1742_s2 + $0xa8] sm:$0xff] }
  0x3c   :  { %971 = vmatprep.subr.bf16.mxu1 %v970_v54  ;;  %v984_v25 = vpack.c.bf16 %v528_v23, %v527_v22  ;;  %v559_v26 = vld [vmem:[%s1742_s2 + $0x110] sm:$0xff]  ;;  %v560_v27 = vld [vmem:[%s1742_s2 + $0x118] sm:$0xff]  ;;  %v577_v31 = vld [vmem:[%s1742_s2 + $0x1a0] sm:$0xff]  ;;  %v986_v32 = vpack.c.bf16 %v546_v30, %v545_v29 }
  0x3d   :  { %v1016_v28 = vpack.c.bf16 %v560_v27, %v559_v26  ;;  %v578_v33 = vld [vmem:[%s1742_s2 + $0x1a8] sm:$0xff]  ;;  %v529_v34 = vld [vmem:[%s1742_s2 + $0x20] sm:$0xff]  ;;  %v547_v41 = vld [vmem:[%s1742_s2 + $0xb0] sm:$0xff] }
  0x3e   :  { %941 = vmatpush1.bf16.msra.mxu0 %v940_v60  ;;  %v530_v35 = vld [vmem:[%s1742_s2 + $0x28] sm:$0xff]  ;;  %v1018_v36 = vpack.c.bf16 %v578_v33, %v577_v31  ;;  %v561_v38 = vld [vmem:[%s1742_s2 + $0x120] sm:$0xff]  ;;  %v548_v42 = vld [vmem:[%s1742_s2 + $0xb8] sm:$0xff] }
  0x3f   :  { %973 = vmatpush1.bf16.msra.mxu1 %v972_v62  ;;  %943 = vmatprep.subr.bf16.mxu0 %v942_v63  ;;  %v988_v37 = vpack.c.bf16 %v530_v35, %v529_v34  ;;  %v562_v39 = vld [vmem:[%s1742_s2 + $0x128] sm:$0xff]  ;;  %v579_v43 = vld [vmem:[%s1742_s2 + $0x1b0] sm:$0xff]  ;;  %v990_v44 = vpack.c.bf16 %v548_v42, %v547_v41  ;;  %v580_v45 = vld [vmem:[%s1742_s2 + $0x1b8] sm:$0xff] }
  0x40   :  { %975 = vmatprep.subr.bf16.mxu1 %v974_v2  ;;  %v1020_v40 = vpack.c.bf16 %v562_v39, %v561_v38  ;;  %v531_v47 = vld [vmem:[%s1742_s2 + $0x30] sm:$0xff]  ;;  %v532_v48 = vld [vmem:[%s1742_s2 + $0x38] sm:$0xff]  ;;  %v1022_v49 = vpack.c.bf16 %v580_v45, %v579_v43  ;;  %v549_v54 = vld [vmem:[%s1742_s2 + $0xc0] sm:$0xff] }
  0x41   :  { %v992_v50 = vpack.c.bf16 %v532_v48, %v531_v47  ;;  %v563_v51 = vld [vmem:[%s1742_s2 + $0x130] sm:$0xff]  ;;  %v564_v52 = vld [vmem:[%s1742_s2 + $0x138] sm:$0xff]  ;;  %v550_v55 = vld [vmem:[%s1742_s2 + $0xc8] sm:$0xff] }
  0x42   :  { %945 = vmatpush1.bf16.msra.mxu0 %v944_v5  ;;  %v1024_v53 = vpack.c.bf16 %v564_v52, %v563_v51  ;;  %v581_v56 = vld [vmem:[%s1742_s2 + $0x1c0] sm:$0xff]  ;;  %v994_v57 = vpack.c.bf16 %v550_v55, %v549_v54  ;;  %v582_v58 = vld [vmem:[%s1742_s2 + $0x1c8] sm:$0xff]  ;;  %v551_v3 = vld [vmem:[%s1742_s2 + $0xd0] sm:$0xff] }
  0x43   :  { %977 = vmatpush1.bf16.msra.mxu1 %v976_v6  ;;  %979 = vmatprep.subr.bf16.mxu0 %v978_v10  ;;  %v533_v59 = vld [vmem:[%s1742_s2 + $0x40] sm:$0xff]  ;;  %v534_v60 = vld [vmem:[%s1742_s2 + $0x48] sm:$0xff]  ;;  %v1026_v62 = vpack.c.bf16 %v582_v58, %v581_v56  ;;  %v552_v4 = vld [vmem:[%s1742_s2 + $0xd8] sm:$0xff] }
  0x44   :  { %v996_v63 = vpack.c.bf16 %v534_v60, %v533_v59  ;;  %v565_v0 = vld [vmem:[%s1742_s2 + $0x140] sm:$0xff]  ;;  %v566_v1 = vld [vmem:[%s1742_s2 + $0x148] sm:$0xff]  ;;  %v583_v5 = vld [vmem:[%s1742_s2 + $0x1d0] sm:$0xff]  ;;  %v998_v6 = vpack.c.bf16 %v552_v4, %v551_v3 }
  0x45   :  { %370 = vmatmul.mubr.f32.vlgmr.msra.gmra.mrb[4].mxu0 %v1353_v46  ;;  %v1028_v2 = vpack.c.bf16 %v566_v1, %v565_v0  ;;  %v584_v8 = vld [vmem:[%s1742_s2 + $0x1d8] sm:$0xff]  ;;  %v535_v9 = vld [vmem:[%s1742_s2 + $0x50] sm:$0xff]  ;;  %v554_v14 = vld [vmem:[%s1742_s2 + $0xe8] sm:$0xff] }
  0x46   :  { %447 = vmatmul.mubr.f32.vlgmr.msra.gmra.mrb[4].mxu1 %v1353_v46  ;;  %375 = vmatprep.mubr.f32.mxu0 %v1102_v7  ;;  %v573_v46 = vld [vmem:[%s1742_s2 + $0x180] sm:$0xff]  ;;  %v1030_v10 = vpack.c.bf16 %v584_v8, %v583_v5  ;;  %v586_v17 = vld [vmem:[%s1742_s2 + $0x1e8] sm:$0xff]  ;;  %v556_v26 = vld [vmem:[%s1742_s2 + $0xf8] sm:$0xff] }
  0x47   :  { %452 = vmatprep.mubr.f32.mxu1 %v1102_v7  ;;  %v574_v7 = vld [vmem:[%s1742_s2 + $0x188] sm:$0xff]  ;;  %v585_v15 = vld [vmem:[%s1742_s2 + $0x1e0] sm:$0xff]  ;;  %v587_v27 = vld [vmem:[%s1742_s2 + $0x1f0] sm:$0xff] }
  0x48   :  { %v1010_v12 = vpack.c.bf16 %v574_v7, %v573_v46  ;;  %v536_v46 = vld [vmem:[%s1742_s2 + $0x58] sm:$0xff]  ;;  %v537_v18 = vld [vmem:[%s1742_s2 + $0x60] sm:$0xff]  ;;  %v538_v19 = vld [vmem:[%s1742_s2 + $0x68] sm:$0xff] }
  0x49   :  { %376 = vmatmul.mubr.f32.gmra.mrb[6].mxu0 %v1390_v61  ;;  %v1000_v7 = vpack.c.bf16 %v536_v46, %v535_v9  ;;  %v1004_v21 = vpack.c.bf16 %v538_v19, %v537_v18  ;;  %v569_v22 = vld [vmem:[%s1742_s2 + $0x160] sm:$0xff]  ;;  %v570_v23 = vld [vmem:[%s1742_s2 + $0x168] sm:$0xff]  ;;  %v588_v29 = vld [vmem:[%s1742_s2 + $0x1f8] sm:$0xff] }
  0x4a   :  { %453 = vmatmul.mubr.f32.gmra.mrb[6].mxu1 %v1390_v61  ;;  %v525_v61 = vld [vmem:[%s1742_s2] sm:$0xff]  ;;  %1011 = vmatprep.subr.bf16.mxu1 %v1010_v12  ;;  %v539_v30 = vld [vmem:[%s1742_s2 + $0x70] sm:$0xff]  ;;  %v540_v31 = vld [vmem:[%s1742_s2 + $0x78] sm:$0xff] }
  0x4b   :  { %v980_v13 = vpack.c.bf16 %v526_v11, %v525_v61  ;;  %1013 = vmatpush3.bf16.msra.mxu1 %v1012_v16  ;;  %v567_v61 = vld [vmem:[%s1742_s2 + $0x150] sm:$0xff]  ;;  %v568_v11 = vld [vmem:[%s1742_s2 + $0x158] sm:$0xff]  ;;  %v1008_v33 = vpack.c.bf16 %v540_v31, %v539_v30 }
  0x4c   :  { %1015 = vmatprep.subr.bf16.mxu1 %v1014_v24  ;;  %v1032_v12 = vpack.c.bf16 %v568_v11, %v567_v61  ;;  %v1036_v24 = vpack.c.bf16 %v570_v23, %v569_v22  ;;  %v571_v34 = vld [vmem:[%s1742_s2 + $0x170] sm:$0xff]  ;;  %v572_v35 = vld [vmem:[%s1742_s2 + $0x178] sm:$0xff] }
  0x4d   :  { %981 = vmatpush3.bf16.msra.mxu0 %v980_v13  ;;  %v553_v13 = vld [vmem:[%s1742_s2 + $0xe0] sm:$0xff] }
  0x4e   :  { %983 = vmatprep.subr.bf16.mxu0 %v982_v20  ;;  %v1002_v16 = vpack.c.bf16 %v554_v14, %v553_v13  ;;  %v1034_v20 = vpack.c.bf16 %v586_v17, %v585_v15 }
  0x4f   :  { %1017 = vmatpush3.bf16.msra.mxu1 %v1016_v28 }
  0x50   :  { %1019 = vmatprep.subr.bf16.mxu1 %v1018_v36  ;;  %v1040_v36 = vpack.c.bf16 %v572_v35, %v571_v34 }
  0x51   :  { %985 = vmatpush3.bf16.msra.mxu0 %v984_v25  ;;  %v555_v25 = vld [vmem:[%s1742_s2 + $0xf0] sm:$0xff]  ;;  %s1103_s2 = smov [#allocation3]  }
  0x52   :  { %987 = vmatprep.subr.bf16.mxu0 %v986_v32  ;;  %v1006_v28 = vpack.c.bf16 %v556_v26, %v555_v25  ;;  %v1038_v32 = vpack.c.bf16 %v588_v29, %v587_v27  ;;  %s755_s9 = sshll.u32 %s1103_s2, 4  ;;  %s756_s9 = int_to_ptr.vmem [resolvable:$true] %s755_s9 }
  0x53   :  { %1021 = vmatpush3.bf16.msra.mxu1 %v1020_v40  ;;  %s1078_s10 = scalar_lea.vmem %s756_s9, 256  ;;  %p1083_p1 = scmp.lt.s32.totalorder %s756_s9, %s756_s9 }
  0x54   :  { %1023 = vmatprep.subr.bf16.mxu1 %v1022_v49  ;;  %p1079_p0 = scmp.ne.s32.totalorder %s756_s9, %s1078_s10  ;;  %p1084_p2 = scmp.lt.s32.totalorder %s1078_s10, %s1078_s10 }
  0x55   :  { %989 = vmatpush3.bf16.msra.mxu0 %v988_v37 }
  0x56   :  { %991 = vmatprep.subr.bf16.mxu0 %v990_v44  ;;  %p1085_p3 = por %p1084_p2, %p1083_p1 }
  0x57   :  { %1025 = vmatpush3.bf16.msra.mxu1 %v1024_v53 }
  0x58   :  { %1027 = vmatprep.subr.bf16.mxu1 %v1026_v62  ;;  %p1086_p4 = pnand %p1085_p3, %p1079_p0 }
  0x59   :  { %993 = vmatpush3.bf16.msra.mxu0 %v992_v50 }
  0x5a   :  { %995 = vmatprep.subr.bf16.mxu0 %v994_v57 }
  0x5b   :  { %1029 = vmatpush3.bf16.msra.mxu1 %v1028_v2 }
  0x5c   :  { %1031 = vmatprep.subr.bf16.mxu1 %v1030_v10 }
  0x5d   :  { %997 = vmatpush3.bf16.msra.mxu0 %v996_v63 }
  0x5e   :  { %999 = vmatprep.subr.bf16.mxu0 %v998_v6 }
  0x5f   :  { %1033 = vmatpush3.bf16.msra.mxu1 %v1032_v12 }
  0x60   :  { %1035 = vmatprep.subr.bf16.mxu1 %v1034_v20 }
  0x61   :  { %1001 = vmatpush3.bf16.msra.mxu0 %v1000_v7 }
  0x62   :  { %1003 = vmatprep.subr.bf16.mxu0 %v1002_v16 }
  0x63   :  { %1037 = vmatpush3.bf16.msra.mxu1 %v1036_v24 }
  0x64   :  { %1039 = vmatprep.subr.bf16.mxu1 %v1038_v32 }
  0x65   :  { %1005 = vmatpush3.bf16.msra.mxu0 %v1004_v21 }
  0x66   :  { %1007 = vmatprep.subr.bf16.mxu0 %v1006_v28 }
  0x67   :  { %1041 = vmatpush3.bf16.msra.mxu1 %v1040_v36 }
  0x69   :  { %1009 = vmatpush3.bf16.msra.mxu0 %v1008_v33 }
  0xf8   :  { %v217_v37 = vpop.f32.mrb[0].mxu0 }
  0xf9   :  { %v766_v38 = vmul.f32 -1.442695, %v217_v37  ;;  %v294_v39 = vpop.f32.mrb[0].mxu1  ;;  %v219_v40 = vpop.f32.mrb[1].mxu0 }
  0xfa   :  { %v768_v41 = vmul.f32 -1.442695, %v294_v39  ;;  %v767_v42 = vmul.f32 -1.442695, %v219_v40  ;;  %v296_v43 = vpop.f32.mrb[1].mxu1 }
  0xfb   :  { %1046 = vpow2.f32 %v766_v38  ;;  %v769_v44 = vmul.f32 -1.442695, %v296_v43 }
  0xfc   :  { %1048 = vpow2.f32 %v768_v41  ;;  %v223_v45 = vpop.f32.mrb[2].mxu0 }
  0xfd   :  { %1050 = vpow2.f32 %v767_v42  ;;  %v770_v47 = vmul.f32 -1.442695, %v223_v45  ;;  %v300_v48 = vpop.f32.mrb[2].mxu1  ;;  %v225_v49 = vpop.f32.mrb[3].mxu0 }
  0xfe   :  { %1052 = vpow2.f32 %v769_v44  ;;  %v772_v50 = vmul.f32 -1.442695, %v300_v48  ;;  %v771_v51 = vmul.f32 -1.442695, %v225_v49  ;;  %v302_v52 = vpop.f32.mrb[3].mxu1 }
  0xff   :  { %1054 = vpow2.f32 %v770_v47  ;;  %v773_v53 = vmul.f32 -1.442695, %v302_v52 }
 0x100   :  { %1056 = vpow2.f32 %v772_v50 }
 0x101   :  { %1058 = vpow2.f32 %v771_v51 }
 0x102   :  { %1060 = vpow2.f32 %v773_v53 }
 0x105   :  { %v1047_v54 = vpop.eup %1046 }
 0x106   :  { %v1049_v55 = vpop.eup %1048  ;;  %v483_v56 = vadd.f32 1.0, %v1047_v54 }
 0x107   :  { %v1051_v57 = vpop.eup %1050  ;;  %v485_v58 = vadd.f32 1.0, %v1049_v55 }
 0x108   :  { %v1053_v59 = vpop.eup %1052  ;;  %v484_v60 = vadd.f32 1.0, %v1051_v57  ;;  %1062 = vrcp.f32 %v483_v56 }
 0x109   :  { %v1055_v62 = vpop.eup %1054  ;;  %v486_v63 = vadd.f32 1.0, %v1053_v59  ;;  %1064 = vrcp.f32 %v485_v58 }
 0x10a   :  { %v1057_v0 = vpop.eup %1056  ;;  %v487_v1 = vadd.f32 1.0, %v1055_v62  ;;  %1066 = vrcp.f32 %v484_v60 }
 0x10b   :  { %v1059_v2 = vpop.eup %1058  ;;  %v489_v3 = vadd.f32 1.0, %v1057_v0  ;;  %1068 = vrcp.f32 %v486_v63 }
 0x10c   :  { %v1061_v4 = vpop.eup %1060  ;;  %v488_v5 = vadd.f32 1.0, %v1059_v2  ;;  %1070 = vrcp.f32 %v487_v1 }
 0x10d   :  { %v490_v6 = vadd.f32 1.0, %v1061_v4  ;;  %1072 = vrcp.f32 %v489_v3 }
 0x10e   :  { %1074 = vrcp.f32 %v488_v5 }
 0x10f   :  { %1076 = vrcp.f32 %v490_v6 }
 0x112   :  { %v1063_v8 = vpop.eup %1062 }
 0x113   :  { %v1065_v9 = vpop.eup %1064  ;;  %v507_v61 = vmul.f32 %v1063_v8, %v217_v37 }
 0x114   :  { %v1067_v46 = vpop.eup %1066  ;;  %v509_v12 = vmul.f32 %v1065_v9, %v294_v39 }
 0x115   :  { %v1069_v10 = vpop.eup %1068  ;;  %v508_v13 = vmul.f32 %v1067_v46, %v219_v40 }
 0x116   :  { %v1071_v7 = vpop.eup %1070  ;;  %v510_v16 = vmul.f32 %v1069_v10, %v296_v43 }
 0x117   :  { %v1073_v11 = vpop.eup %1072  ;;  %v511_v24 = vmul.f32 %v1071_v7, %v223_v45 }
 0x118   :  { %v371_v14 = vpop.f32.mrb[4].mxu0  ;;  %v1075_v15 = vpop.eup %1074  ;;  %v513_v26 = vmul.f32 %v1073_v11, %v300_v48 }
 0x119   :  { %v515_v17 = vmul.f32 %v507_v61, %v371_v14  ;;  %v448_v18 = vpop.f32.mrb[4].mxu1  ;;  %v373_v19 = vpop.f32.mrb[5].mxu0  ;;  %v512_v27 = vmul.f32 %v1075_v15, %v225_v49 }
 0x11a   :  { %v1077_v20 = vpop.eup %1076  ;;  %v517_v21 = vmul.f32 %v509_v12, %v448_v18  ;;  %v516_v22 = vmul.f32 %v508_v13, %v373_v19  ;;  %v450_v23 = vpop.f32.mrb[5].mxu1 }
 0x11b   :  { %v518_v25 = vmul.f32 %v510_v16, %v450_v23  ;;  %v514_v29 = vmul.f32 %v1077_v20, %v302_v52 }
 0x11c   :  { %v377_v28 = vpop.f32.mrb[6].mxu0  ;;  %653 = vmatprep.mubr.f32.mxu0 %v516_v22 }
 0x11d   :  { %v519_v30 = vmul.f32 %v511_v24, %v377_v28  ;;  %v454_v31 = vpop.f32.mrb[6].mxu1  ;;  %728 = vmatprep.mubr.f32.mxu1 %v518_v25  ;;  %v379_v32 = vpop.f32.mrb[7].mxu0  ;;  %654 = vmatmul.mubr.f32.vlgmr.msra.gmra.mrb[8].mxu0 %v515_v17 }
 0x11e   :  { %v521_v33 = vmul.f32 %v513_v26, %v454_v31  ;;  %v520_v34 = vmul.f32 %v512_v27, %v379_v32  ;;  %v456_v35 = vpop.f32.mrb[7].mxu1  ;;  %729 = vmatmul.mubr.f32.vlgmr.msra.gmra.mrb[8].mxu1 %v517_v21 }
 0x11f   :  { %v522_v36 = vmul.f32 %v514_v29, %v456_v35 }
 0x120   :  { %658 = vmatprep.mubr.f32.mxu0 %v520_v34 }
 0x121   :  { %733 = vmatprep.mubr.f32.mxu1 %v522_v36  ;;  %659 = vmatmul.mubr.f32.gmra.mrb[10].mxu0 %v519_v30 }
 0x122   :  { %734 = vmatmul.mubr.f32.gmra.mrb[10].mxu1 %v521_v33 }
 0x1f0   :  { %v806_v37 = vpop.f32.mrb[8].mxu0 }
 0x1f1   :  { %v844_v38 = vpop.f32.mrb[8].mxu1  ;;  %v807_v39 = vpop.f32.mrb[9].mxu0 }
 0x1f2   :  { %v808_v40 = vadd.f32 %v807_v39, %v806_v37  ;;  %v845_v41 = vpop.f32.mrb[9].mxu1 }
 0x1f3   :  { %v846_v42 = vadd.f32 %v845_v41, %v844_v38 }
 0x1f4   :  { %v809_v43 = vpop.f32.mrb[10].mxu0 }
 0x1f5   :  { %v731_v44 = vadd.f32 %v846_v42, %v808_v40  ;;  %v847_v45 = vpop.f32.mrb[10].mxu1  ;;  %v810_v47 = vpop.f32.mrb[11].mxu0 }
 0x1f6   :  { %v811_v48 = vadd.f32 %v810_v47, %v809_v43  ;;  %v848_v49 = vpop.f32.mrb[11].mxu1 }
 0x1f7   :  { %748 = vst [vmem:[#allocation3] sm:$0xff] %v731_v44  ;;  %v849_v50 = vadd.f32 %v848_v49, %v847_v45 }
 0x1f9   :  { %v736_v51 = vadd.f32 %v849_v50, %v811_v48 }
 0x1fb   :  { %749 = vst [vmem:[#allocation3 + $0x8] sm:$0xff] %v736_v51 }
 0x1fc   :  { %1089 = shalt.err (!%p1086_p4)
}
 0x1fd   :  { %s1090_s13 = scalar_lea.hbm %s1743_s3, 256 }
 0x1fe   :  { %p1091_p5 = scmp.ne.s32.totalorder %s1743_s3, %s1090_s13  ;;  %p1094_p6 = scmp.lt.u32.totalorder %s1090_s13, %s1743_s3 }
 0x200   :  { %p1096_p7 = pnand %p1094_p6, %p1091_p5 }
 0x202   :  { %1099 = shalt.err (!%p1096_p7)
}
 0x203   :  { %s1104_s18 = smov 128   ;;  %s1105_s19 = smov 8  }
 0x204   :  { %761 = dma.vmem_to_hbm [thread:$0]  %s756_s9, 256, %s1743_s3, [#allocation4], %s1104_s18, %s1104_s18, %s1105_s19  }
 0x205   :  { %1100 = dma.done.wait [#allocation4], 256  }
 0x206   :  { %1101 = vsyncadd [#allocation4], 4294967040 }
 0x207   :  { %765 = vsyncpa [#allocation4], 1 }

</bundles_post_ra>
